<compile_context>
chip_gen: v7x
topology: tpu7x:2x2x1
jax: 0.10.0
libtpu: 0.0.40
codegen_flags: <defaults>
</compile_context>

<pallas_src>
import functools

import jax
import jax.numpy as jnp
from jax.experimental import pallas as pl
from jax.experimental.pallas import tpu as pltpu


def _round_up(x, m):
    return (x + m - 1) // m * m


def _embeddings_kernel(wid_ref, pid_ref, tid_ref,     # (tm, 1) int32 ids (offset into combined table)
                       planes_ref,                    # (3, R, H) bf16 table planes (resident)
                       gamma_ref, beta_ref,           # (1, H) LayerNorm params
                       o_ref,                         # (tm, H) output tile
                       *, eps):
    tm, H = o_ref.shape
    R = planes_ref.shape[1]

    # Vectorized gather: build a (tm, R) "three-hot" selection matrix (each row
    # has exactly one 1 in the word segment, one in the position segment and
    # one in the token-type segment of the combined table) and contract it
    # against the table on the MXU.  No per-token loop, no masked row stores.
    cols = jax.lax.broadcasted_iota(jnp.int32, (tm, R), 1)
    sel = (cols == wid_ref[...]) | (cols == pid_ref[...]) | (cols == tid_ref[...])
    onehot = jnp.where(sel, 1.0, 0.0).astype(jnp.bfloat16)

    # Three bf16 planes reconstruct the original f32 table to ~f32 precision;
    # each bf16 matmul accumulates in f32 on the MXU and is exact for 0/1
    # selection, so the gathered sum matches the f32 reference.
    x = jnp.dot(onehot, planes_ref[0], preferred_element_type=jnp.float32)
    x = x + jnp.dot(onehot, planes_ref[1], preferred_element_type=jnp.float32)
    x = x + jnp.dot(onehot, planes_ref[2], preferred_element_type=jnp.float32)

    # LayerNorm, fully vectorized over the (tm, H) tile, f32 math, straight
    # from registers (no VMEM scratch round-trip).
    mean = jnp.mean(x, axis=-1, keepdims=True)
    xc = x - mean
    var = jnp.mean(xc * xc, axis=-1, keepdims=True)
    inv = jax.lax.rsqrt(var + eps)
    y = xc * inv * gamma_ref[...].astype(jnp.float32) + beta_ref[...].astype(jnp.float32)
    o_ref[...] = y.astype(o_ref.dtype)
    # Dropout is identity at inference (see TODO at top of file).


def roberta_embeddings(input_ids, token_type_ids,
                       word_emb, pos_emb, tt_emb, gamma, beta,
                       *, padding_idx, eps=1e-12, tm=None):
    """input_ids/token_type_ids: [B, S] int32; tables: [V,H], [P,H], [T,H]."""
    B, S = input_ids.shape
    V, H = word_emb.shape
    P = pos_emb.shape[0]
    T = tt_emb.shape[0]
    M = B * S

    # create_position_ids_from_input_ids (index math stays in the wrapper).
    mask = (input_ids != padding_idx).astype(jnp.int32)
    position_ids = jnp.cumsum(mask, axis=1) * mask + padding_idx
    if token_type_ids is None:
        token_type_ids = jnp.zeros_like(input_ids)

    # Clamp indices: Pallas performs no bounds check on VMEM reads, and the
    # one-hot selection would silently produce zeros for OOB ids otherwise.
    wid = jnp.clip(input_ids.astype(jnp.int32), 0, V - 1)
    pid = jnp.clip(position_ids.astype(jnp.int32), 0, P - 1)
    tid = jnp.clip(token_type_ids.astype(jnp.int32), 0, T - 1)

    # Combined table [word; pos; tt], row dim padded to a lane-friendly
    # multiple of 128; ids are offset into their segment of the combined table.
    R0 = V + P + T
    R = _round_up(R0, 128)
    combined = jnp.concatenate([word_emb.astype(jnp.float32),
                                pos_emb.astype(jnp.float32),
                                tt_emb.astype(jnp.float32)], axis=0)
    combined = jnp.pad(combined, ((0, R - R0), (0, 0)))

    # Split the f32 table into 3 bf16 planes (hi/mid/lo) -> exact f32 gather
    # via bf16 MXU matmuls with f32 accumulation.
    p0 = combined.astype(jnp.bfloat16)
    r1 = combined - p0.astype(jnp.float32)
    p1 = r1.astype(jnp.bfloat16)
    r2 = r1 - p1.astype(jnp.float32)
    p2 = r2.astype(jnp.bfloat16)
    planes = jnp.stack([p0, p1, p2], axis=0)          # (3, R, H) bf16

    wid = wid.reshape(M)
    pid = pid.reshape(M) + V
    tid = tid.reshape(M) + V + P

    # Large, 8-aligned token tile; bounded so the in-register (tm, R) one-hot
    # stays small.  Pad M instead of asserting divisibility.
    if tm is None:
        tm = min(512, _round_up(M, 8))
        max_tm = max(8, (((8 * 1024 * 1024) // (2 * R)) // 8) * 8)
        tm = max(8, min(tm, max_tm))
    M_pad = _round_up(M, tm)
    pad = M_pad - M
    if pad:
        wid = jnp.concatenate([wid, jnp.zeros((pad,), jnp.int32)])
        pid = jnp.concatenate([pid, jnp.full((pad,), V, jnp.int32)])
        tid = jnp.concatenate([tid, jnp.full((pad,), V + P, jnp.int32)])
    # Padded tail rows gather valid (arbitrary) rows, get LayerNorm'd and are
    # sliced off below; they are never observable in the returned array.
    wid = wid.reshape(M_pad, 1)
    pid = pid.reshape(M_pad, 1)
    tid = tid.reshape(M_pad, 1)

    gamma2d = gamma.reshape(1, H).astype(jnp.float32)
    beta2d = beta.reshape(1, H).astype(jnp.float32)

    out_dtype = word_emb.dtype
    out_itemsize = jnp.dtype(out_dtype).itemsize

    # VMEM budget sized from the actual buffers (x2 for default double
    # buffering) + headroom, capped at 75% of the chip's physical VMEM so it
    # never claims the whole per-TC VMEM (important on v7x's 64 MiB).
    buf_bytes = (planes.size * 2            # bf16 table planes
                 + 3 * tm * 4               # id blocks
                 + 2 * H * 4                # gamma / beta
                 + tm * H * out_itemsize)   # output tile
    vmem_needed = 2 * buf_bytes + (4 << 20)
    try:
        vmem_cap = int(pltpu.get_tpu_info().vmem_capacity_bytes)
    except Exception:
        vmem_cap = 64 << 20
    vmem_limit = int(min(max(vmem_needed, 16 << 20), (vmem_cap * 3) // 4))

    kernel = functools.partial(_embeddings_kernel, eps=float(eps))

    out2d = pl.pallas_call(
        kernel,
        out_shape=jax.ShapeDtypeStruct((M_pad, H), out_dtype),
        grid_spec=pltpu.PrefetchScalarGridSpec(
            num_scalar_prefetch=0,
            grid=(M_pad // tm,),
            in_specs=[
                pl.BlockSpec((tm, 1), lambda i: (i, 0)),     # word ids
                pl.BlockSpec((tm, 1), lambda i: (i, 0)),     # position ids (offset)
                pl.BlockSpec((tm, 1), lambda i: (i, 0)),     # token-type ids (offset)
                # Combined table planes: full-shape block, constant index_map
                # -> DMA'd once, resident in VMEM across the grid.
                pl.BlockSpec((3, R, H), lambda i: (0, 0, 0)),
                pl.BlockSpec((1, H), lambda i: (0, 0)),
                pl.BlockSpec((1, H), lambda i: (0, 0)),
            ],
            # Output is lane-dense for real RoBERTa (H=768); for toy H<128 the
            # store is masked — acceptable at test scale (see review note).
            out_specs=pl.BlockSpec((tm, H), lambda i: (i, 0)),
        ),
        compiler_params=pltpu.CompilerParams(
            dimension_semantics=("parallel",),
            vmem_limit_bytes=vmem_limit,
        ),
    )(wid, pid, tid, planes, gamma2d, beta2d)

    return out2d[:M].reshape(B, S, H)


def _reference(input_ids, token_type_ids, word_emb, pos_emb, tt_emb,
               gamma, beta, padding_idx, eps):
    mask = (input_ids != padding_idx).astype(jnp.int32)
    position_ids = jnp.cumsum(mask, axis=1) * mask + padding_idx
    x = word_emb[input_ids] + pos_emb[position_ids] + tt_emb[token_type_ids]
    mean = jnp.mean(x, axis=-1, keepdims=True)
    var = jnp.mean((x - mean) ** 2, axis=-1, keepdims=True)
    return (x - mean) * jax.lax.rsqrt(var + eps) * gamma + beta


if __name__ == "__main__":
    # Small config: batch=2, seq=8, hidden=32, vocab=100, max_pos=40, types=2
    B, S, H = 2, 8, 32
    V, P, T = 100, 40, 2
    pad_id = 1
    eps = 1e-5

    key = jax.random.PRNGKey(0)
    k_ids, k_w, k_p, k_t, k_g, k_b = jax.random.split(key, 6)

    input_ids = jax.random.randint(k_ids, (B, S), 2, V, dtype=jnp.int32)
    # pad the tail of sequence 1 to exercise the position-id path
    input_ids = input_ids.at[1, 5:].set(pad_id)
    token_type_ids = jnp.zeros((B, S), dtype=jnp.int32)

    word_emb = jax.random.normal(k_w, (V, H), jnp.float32) * 0.02
    pos_emb = jax.random.normal(k_p, (P, H), jnp.float32) * 0.02
    tt_emb = jax.random.normal(k_t, (T, H), jnp.float32) * 0.02
    # nn.Embedding(padding_idx=...) zero-initializes the padding row
    word_emb = word_emb.at[pad_id].set(0.0)
    pos_emb = pos_emb.at[pad_id].set(0.0)

    gamma = 1.0 + 0.1 * jax.random.normal(k_g, (H,), jnp.float32)
    beta = 0.1 * jax.random.normal(k_b, (H,), jnp.float32)

    out = roberta_embeddings(input_ids, token_type_ids, word_emb, pos_emb,
                             tt_emb, gamma, beta, padding_idx=pad_id, eps=eps)
    out = jax.block_until_ready(out)

    ref = _reference(input_ids, token_type_ids, word_emb, pos_emb, tt_emb,
                     gamma, beta, pad_id, eps)

    assert out.shape == (B, S, H)
    assert jnp.allclose(out, ref, atol=2e-5, rtol=2e-5), "mismatch vs reference"

    print("KERNEL_OK")
</pallas_src>

<mosaic_0001>
module attributes {stable_mosaic.version = 11 : i64} {
  func.func @_embeddings_kernel(%arg0: i32, %arg1: memref<16x1xi32, #tpu.memory_space<vmem>>, %arg2: memref<16x1xi32, #tpu.memory_space<vmem>>, %arg3: memref<16x1xi32, #tpu.memory_space<vmem>>, %arg4: memref<3x256x32xbf16, #tpu.memory_space<vmem>>, %arg5: memref<1x32xf32, #tpu.memory_space<vmem>>, %arg6: memref<1x32xf32, #tpu.memory_space<vmem>>, %arg7: memref<16x32xf32, #tpu.memory_space<vmem>>) attributes {dimension_semantics = [#tpu.dimension_semantics<parallel>], iteration_bounds = array<i64: 1>, scalar_prefetch = 0 : i64, scratch_operands = 0 : i64, tpu.core_type = #tpu.core_type<tc>, window_params = [{transform_indices = @transform_0, window_bounds = array<i64: 16, 1>}, {transform_indices = @transform_1, window_bounds = array<i64: 16, 1>}, {transform_indices = @transform_2, window_bounds = array<i64: 16, 1>}, {pipeline_mode = #tpu.pipeline_mode<synchronous>, transform_indices = @transform_3, window_bounds = array<i64: 3, 256, 32>}, {pipeline_mode = #tpu.pipeline_mode<synchronous>, transform_indices = @transform_4, window_bounds = array<i64: 1, 32>}, {pipeline_mode = #tpu.pipeline_mode<synchronous>, transform_indices = @transform_5, window_bounds = array<i64: 1, 32>}, {transform_indices = @transform_6, window_bounds = array<i64: 16, 32>}]} {
    %0 = tpu.iota {dimensions = array<i32: 1>} : vector<16x256xi32>
    %c0 = arith.constant 0 : index
    %c0_0 = arith.constant 0 : index
    %1 = vector.load %arg1[%c0, %c0_0] : memref<16x1xi32, #tpu.memory_space<vmem>>, vector<16x1xi32>
    %2 = vector.broadcast %1 : vector<16x1xi32> to vector<16x256xi32>
    %3 = arith.cmpi eq, %0, %2 : vector<16x256xi32>
    %c0_1 = arith.constant 0 : index
    %c0_2 = arith.constant 0 : index
    %4 = vector.load %arg2[%c0_1, %c0_2] : memref<16x1xi32, #tpu.memory_space<vmem>>, vector<16x1xi32>
    %5 = vector.broadcast %4 : vector<16x1xi32> to vector<16x256xi32>
    %6 = arith.cmpi eq, %0, %5 : vector<16x256xi32>
    %7 = arith.ori %3, %6 : vector<16x256xi1>
    %c0_3 = arith.constant 0 : index
    %c0_4 = arith.constant 0 : index
    %8 = vector.load %arg3[%c0_3, %c0_4] : memref<16x1xi32, #tpu.memory_space<vmem>>, vector<16x1xi32>
    %9 = vector.broadcast %8 : vector<16x1xi32> to vector<16x256xi32>
    %10 = arith.cmpi eq, %0, %9 : vector<16x256xi32>
    %11 = arith.ori %7, %10 : vector<16x256xi1>
    %cst = arith.constant 1.000000e+00 : f32
    %cst_5 = arith.constant 0.000000e+00 : f32
    %12 = vector.broadcast %cst : f32 to vector<16x256xf32>
    %13 = vector.broadcast %cst_5 : f32 to vector<16x256xf32>
    %14 = arith.select %11, %12, %13 : vector<16x256xi1>, vector<16x256xf32>
    %15 = arith.truncf %14 : vector<16x256xf32> to vector<16x256xbf16>
    %c0_6 = arith.constant 0 : index
    %c0_7 = arith.constant 0 : index
    %c0_8 = arith.constant 0 : index
    %16 = vector.load %arg4[%c0_6, %c0_7, %c0_8] : memref<3x256x32xbf16, #tpu.memory_space<vmem>>, vector<1x256x32xbf16>
    %17 = vector.shape_cast %16 : vector<1x256x32xbf16> to vector<256x32xbf16>
    %cst_9 = arith.constant dense<0.000000e+00> : vector<16x32xf32>
    %18 = tpu.matmul %15, %17, %cst_9 {dimension_numbers = #tpu.dot_dimension_numbers<[1], [0], [0], [1], [0, 0, 1, 1], [], []>} : vector<16x256xbf16>, vector<256x32xbf16>, vector<16x32xf32> -> vector<16x32xf32>
    %c1 = arith.constant 1 : index
    %c0_10 = arith.constant 0 : index
    %c0_11 = arith.constant 0 : index
    %19 = vector.load %arg4[%c1, %c0_10, %c0_11] : memref<3x256x32xbf16, #tpu.memory_space<vmem>>, vector<1x256x32xbf16>
    %20 = vector.shape_cast %19 : vector<1x256x32xbf16> to vector<256x32xbf16>
    %cst_12 = arith.constant dense<0.000000e+00> : vector<16x32xf32>
    %21 = tpu.matmul %15, %20, %cst_12 {dimension_numbers = #tpu.dot_dimension_numbers<[1], [0], [0], [1], [0, 0, 1, 1], [], []>} : vector<16x256xbf16>, vector<256x32xbf16>, vector<16x32xf32> -> vector<16x32xf32>
    %22 = arith.addf %18, %21 : vector<16x32xf32>
    %c2 = arith.constant 2 : index
    %c0_13 = arith.constant 0 : index
    %c0_14 = arith.constant 0 : index
    %23 = vector.load %arg4[%c2, %c0_13, %c0_14] : memref<3x256x32xbf16, #tpu.memory_space<vmem>>, vector<1x256x32xbf16>
    %24 = vector.shape_cast %23 : vector<1x256x32xbf16> to vector<256x32xbf16>
    %cst_15 = arith.constant dense<0.000000e+00> : vector<16x32xf32>
    %25 = tpu.matmul %15, %24, %cst_15 {dimension_numbers = #tpu.dot_dimension_numbers<[1], [0], [0], [1], [0, 0, 1, 1], [], []>} : vector<16x256xbf16>, vector<256x32xbf16>, vector<16x32xf32> -> vector<16x32xf32>
    %26 = arith.addf %22, %25 : vector<16x32xf32>
    %cst_16 = arith.constant dense<0.000000e+00> : vector<16xf32>
    %27 = vector.multi_reduction <add>, %26, %cst_16 [1] : vector<16x32xf32> to vector<16xf32>
    %28 = vector.shape_cast %27 : vector<16xf32> to vector<16x1xf32>
    %cst_17 = arith.constant 3.200000e+01 : f32
    %29 = vector.broadcast %cst_17 : f32 to vector<16x1xf32>
    %30 = arith.divf %28, %29 : vector<16x1xf32>
    %31 = vector.broadcast %30 : vector<16x1xf32> to vector<16x32xf32>
    %32 = arith.subf %26, %31 : vector<16x32xf32>
    %33 = arith.mulf %32, %32 : vector<16x32xf32>
    %cst_18 = arith.constant dense<0.000000e+00> : vector<16xf32>
    %34 = vector.multi_reduction <add>, %33, %cst_18 [1] : vector<16x32xf32> to vector<16xf32>
    %35 = vector.shape_cast %34 : vector<16xf32> to vector<16x1xf32>
    %cst_19 = arith.constant 3.200000e+01 : f32
    %36 = vector.broadcast %cst_19 : f32 to vector<16x1xf32>
    %37 = arith.divf %35, %36 : vector<16x1xf32>
    %cst_20 = arith.constant 9.99999974E-6 : f32
    %38 = vector.broadcast %cst_20 : f32 to vector<16x1xf32>
    %39 = arith.addf %37, %38 : vector<16x1xf32>
    %40 = math.rsqrt %39 : vector<16x1xf32>
    %41 = vector.broadcast %40 : vector<16x1xf32> to vector<16x32xf32>
    %42 = arith.mulf %32, %41 : vector<16x32xf32>
    %c0_21 = arith.constant 0 : index
    %c0_22 = arith.constant 0 : index
    %43 = vector.load %arg5[%c0_21, %c0_22] : memref<1x32xf32, #tpu.memory_space<vmem>>, vector<1x32xf32>
    %44 = vector.broadcast %43 : vector<1x32xf32> to vector<16x32xf32>
    %45 = arith.mulf %42, %44 : vector<16x32xf32>
    %c0_23 = arith.constant 0 : index
    %c0_24 = arith.constant 0 : index
    %46 = vector.load %arg6[%c0_23, %c0_24] : memref<1x32xf32, #tpu.memory_space<vmem>>, vector<1x32xf32>
    %47 = vector.broadcast %46 : vector<1x32xf32> to vector<16x32xf32>
    %48 = arith.addf %45, %47 : vector<16x32xf32>
    %c0_25 = arith.constant 0 : index
    %c0_26 = arith.constant 0 : index
    %49 = vector.load %arg7[%c0_25, %c0_26] : memref<16x32xf32, #tpu.memory_space<vmem>>, vector<16x32xf32>
    tpu.vector_store %arg7[%c0_25, %c0_26], %48 {strides = array<i32>} : memref<16x32xf32, #tpu.memory_space<vmem>>, vector<16x32xf32>,
    return
  }
  func.func @transform_0(%arg0: i32) -> (i32, i32) {
    %c0_i32 = arith.constant 0 : i32
    %c0_i32_0 = arith.constant 0 : i32
    return %arg0, %c0_i32 : i32, i32
  }
  func.func @transform_1(%arg0: i32) -> (i32, i32) {
    %c0_i32 = arith.constant 0 : i32
    %c0_i32_0 = arith.constant 0 : i32
    return %arg0, %c0_i32 : i32, i32
  }
  func.func @transform_2(%arg0: i32) -> (i32, i32) {
    %c0_i32 = arith.constant 0 : i32
    %c0_i32_0 = arith.constant 0 : i32
    return %arg0, %c0_i32 : i32, i32
  }
  func.func @transform_3(%arg0: i32) -> (i32, i32, i32) {
    %c0_i32 = arith.constant 0 : i32
    %c0_i32_0 = arith.constant 0 : i32
    %c0_i32_1 = arith.constant 0 : i32
    %c0_i32_2 = arith.constant 0 : i32
    return %c0_i32, %c0_i32_0, %c0_i32_1 : i32, i32, i32
  }
  func.func @transform_4(%arg0: i32) -> (i32, i32) {
    %c0_i32 = arith.constant 0 : i32
    %c0_i32_0 = arith.constant 0 : i32
    %c0_i32_1 = arith.constant 0 : i32
    return %c0_i32, %c0_i32_0 : i32, i32
  }
  func.func @transform_5(%arg0: i32) -> (i32, i32) {
    %c0_i32 = arith.constant 0 : i32
    %c0_i32_0 = arith.constant 0 : i32
    %c0_i32_1 = arith.constant 0 : i32
    return %c0_i32, %c0_i32_0 : i32, i32
  }
  func.func @transform_6(%arg0: i32) -> (i32, i32) {
    %c0_i32 = arith.constant 0 : i32
    %c0_i32_0 = arith.constant 0 : i32
    return %arg0, %c0_i32 : i32, i32
  }
}

</mosaic_0001>

<bundles_post_ra>
// kernel: tpu_custom_call.1
= control target key start
LH: loop header
LB: loop body
LE: loop exit
PB: predicated region body
PF: predicated region fallthrough
CT: control target
= control target key end

     0   :  { %v928_v2 = vmov 0   ;;  %s1164_s0 = inlined_call_operand.vmem [shape: s32[16,1], index: 0, kind: input, shape index: {}]   ;;  %s1165_s1 = inlined_call_operand.vmem [shape: s32[16,1], index: 1, kind: input, shape index: {}]   ;;  %s1166_s2 = inlined_call_operand.vmem [shape: s32[16,1], index: 2, kind: input, shape index: {}]   ;;  %s1167_s3 = inlined_call_operand.vmem [shape: bf16[3,256,32], index: 3, kind: input, shape index: {}]   ;;  %s1168_s4 = inlined_call_operand.vmem [shape: f32[1,32], index: 4, kind: input, shape index: {}]   ;;  %s1169_s5 = inlined_call_operand.vmem [shape: f32[1,32], index: 5, kind: input, shape index: {}]   ;;  %s1170_s6 = inlined_call_operand.hbm [shape: f32[16,32], index: 6, kind: output, shape index: {}]  }
   0x1   :  { %v40_v0 = vld [vmem:[%s1165_s1] sm:$0xff]  ;;  %851 = vset.pattern.permute.xlu1 %v928_v2  ;;  %850 = vset.pattern.permute.xlu0 %v928_v2  ;;  %v41_v3 = vld [vmem:[%s1165_s1 + $0x8] sm:$0xff]  ;;  %v860_v15 = vld [vmem:[%s1167_s3 + $0xd0] sm:$0xff]  }
   0x2   :  { %v28_v1 = vld [vmem:[%s1164_s0] sm:$0xff]  ;;  %v29_v4 = vld [vmem:[%s1164_s0 + $0x8] sm:$0xff]  ;;  %43 = vperm.xlu1 %851, %v40_v0   ;;  %v861_v16 = vld [vmem:[%s1167_s3 + $0x90] sm:$0xff]  }
   0x3   :  { %31 = vperm.xlu0 %850, %v28_v1   ;;  %v852_v5 = vld [vmem:[%s1167_s3 + $0xc0] sm:$0xff]   ;;  %v57_v8 = vld [vmem:[%s1166_s2 + $0x8] sm:$0xff]  ;;  %v862_v17 = vld [vmem:[%s1167_s3 + $0x50] sm:$0xff]  }
   0x4   :  { %v853_v6 = vld [vmem:[%s1167_s3 + $0x80] sm:$0xff]   ;;  %779 = vmatprep.subr.bf16.mxu0 %v852_v5  ;;  %v856_v11 = vld [vmem:[%s1167_s3 + $0xc8] sm:$0xff]   ;;  %v863_v18 = vld [vmem:[%s1167_s3 + $0x10] sm:$0xff]  }
   0x5   :  { %v854_v7 = vld [vmem:[%s1167_s3 + $0x40] sm:$0xff]   ;;  %780 = vmatpush3.bf16.msra.mxu0 %v853_v6  ;;  %v857_v12 = vld [vmem:[%s1167_s3 + $0x88] sm:$0xff]   ;;  %v864_v19 = vld [vmem:[%s1167_s3 + $0xd8] sm:$0xff]  }
   0x6   :  { %v56_v9 = vld [vmem:[%s1166_s2] sm:$0xff]  ;;  %46 = vperm.xlu1 %851, %v41_v3   ;;  %801 = vmatprep.subr.bf16.mxu1 %v854_v7  ;;  %v858_v13 = vld [vmem:[%s1167_s3 + $0x48] sm:$0xff]   ;;  %v865_v20 = vld [vmem:[%s1167_s3 + $0x98] sm:$0xff]  }
   0x7   :  { %v855_v10 = vld [vmem:[%s1167_s3] sm:$0xff]   ;;  %34 = vperm.xlu0 %850, %v29_v4   ;;  %781 = vmatprep.subr.bf16.mxu0 %v856_v11  ;;  %v859_v14 = vld [vmem:[%s1167_s3 + $0x8] sm:$0xff]   ;;  %v866_v21 = vld [vmem:[%s1167_s3 + $0x58] sm:$0xff]  }
   0x8   :  { %802 = vmatpush3.bf16.msra.mxu1 %v855_v10  ;;  %v867_v22 = vld [vmem:[%s1167_s3 + $0x18] sm:$0xff]   ;;  %v868_v23 = vld [vmem:[%s1167_s3 + $0xe0] sm:$0xff]   ;;  %v872_v27 = vld [vmem:[%s1167_s3 + $0xe8] sm:$0xff]  }
   0x9   :  { %782 = vmatpush3.bf16.msra.mxu0 %v857_v12  ;;  %803 = vmatprep.subr.bf16.mxu1 %v858_v13  ;;  %v869_v24 = vld [vmem:[%s1167_s3 + $0xa0] sm:$0xff]   ;;  %v873_v28 = vld [vmem:[%s1167_s3 + $0xa8] sm:$0xff]   ;;  %v876_v31 = vld [vmem:[%s1167_s3 + $0xf0] sm:$0xff]  }
   0xa   :  { %62 = vperm.xlu1 %851, %v57_v8   ;;  %783 = vmatprep.subr.bf16.mxu0 %v860_v15  ;;  %v870_v25 = vld [vmem:[%s1167_s3 + $0x60] sm:$0xff]   ;;  %v874_v29 = vld [vmem:[%s1167_s3 + $0x68] sm:$0xff]   ;;  %v877_v32 = vld [vmem:[%s1167_s3 + $0xb0] sm:$0xff]  }
   0xb   :  { %59 = vperm.xlu0 %850, %v56_v9   ;;  %v871_v26 = vld [vmem:[%s1167_s3 + $0x20] sm:$0xff]   ;;  %v875_v30 = vld [vmem:[%s1167_s3 + $0x28] sm:$0xff]   ;;  %v878_v33 = vld [vmem:[%s1167_s3 + $0x70] sm:$0xff]  }
   0xc   :  { %804 = vmatpush3.bf16.msra.mxu1 %v859_v14  ;;  %v879_v34 = vld [vmem:[%s1167_s3 + $0x30] sm:$0xff]   ;;  %v880_v35 = vld [vmem:[%s1167_s3 + $0xf8] sm:$0xff]   ;;  %v884_v39 = vld [vmem:[%s1167_s3 + $0x140] sm:$0xff]  }
   0xd   :  { %784 = vmatpush3.bf16.msra.mxu0 %v861_v16  ;;  %805 = vmatprep.subr.bf16.mxu1 %v862_v17  ;;  %v881_v36 = vld [vmem:[%s1167_s3 + $0xb8] sm:$0xff]  }
   0xe   :  { %785 = vmatprep.subr.bf16.mxu0 %v864_v19  ;;  %v882_v37 = vld [vmem:[%s1167_s3 + $0x78] sm:$0xff]  }
   0xf   :  { %v883_v38 = vld [vmem:[%s1167_s3 + $0x38] sm:$0xff]  }
  0x10   :  { %806 = vmatpush3.bf16.msra.mxu1 %v863_v18 }
  0x11   :  { %786 = vmatpush3.bf16.msra.mxu0 %v865_v20  ;;  %807 = vmatprep.subr.bf16.mxu1 %v866_v21 }
  0x12   :  { %787 = vmatprep.subr.bf16.mxu0 %v868_v23 }
  0x14   :  { %808 = vmatpush3.bf16.msra.mxu1 %v867_v22 }
  0x15   :  { %788 = vmatpush3.bf16.msra.mxu0 %v869_v24  ;;  %809 = vmatprep.subr.bf16.mxu1 %v870_v25 }
  0x16   :  { %789 = vmatprep.subr.bf16.mxu0 %v872_v27 }
  0x18   :  { %810 = vmatpush3.bf16.msra.mxu1 %v871_v26 }
  0x19   :  { %790 = vmatpush3.bf16.msra.mxu0 %v873_v28  ;;  %811 = vmatprep.subr.bf16.mxu1 %v874_v29 }
  0x1a   :  { %791 = vmatprep.subr.bf16.mxu0 %v876_v31 }
  0x1c   :  { %812 = vmatpush3.bf16.msra.mxu1 %v875_v30 }
  0x1d   :  { %792 = vmatpush3.bf16.msra.mxu0 %v877_v32  ;;  %813 = vmatprep.subr.bf16.mxu1 %v878_v33 }
  0x1e   :  { %793 = vmatprep.subr.bf16.mxu0 %v880_v35 }
  0x20   :  { %814 = vmatpush3.bf16.msra.mxu1 %v879_v34 }
  0x21   :  { %794 = vmatpush3.bf16.msra.mxu0 %v881_v36  ;;  %815 = vmatprep.subr.bf16.mxu1 %v882_v37 }
  0x22   :  { %823 = vmatprep.subr.bf16.mxu0 %v884_v39 }
  0x24   :  { %816 = vmatpush3.bf16.msra.mxu1 %v883_v38 }
  0x25   :  { %11 = vsyncpa [#allocation3], 0  ;;  %v25_v40 = vlaneseq  ;;  %v885_v49 = vld [vmem:[%s1167_s3 + $0x100] sm:$0xff]   ;;  %v886_v50 = vld [vmem:[%s1167_s3 + $0x148] sm:$0xff]   ;;  %v929_v51 = vmov 1.0|1.0  }
  0x26   :  { %v887_v53 = vld [vmem:[%s1167_s3 + $0x108] sm:$0xff]   ;;  %v888_v54 = vld [vmem:[%s1167_s3 + $0x150] sm:$0xff]   ;;  %v890_v56 = vld [vmem:[%s1167_s3 + $0x158] sm:$0xff]   ;;  %s930_s24 = smov [#allocation2]  }
  0x27   :  { %v26_v41 = vand.u32 127, %v25_v40  ;;  %v889_v55 = vld [vmem:[%s1167_s3 + $0x110] sm:$0xff]   ;;  %v891_v57 = vld [vmem:[%s1167_s3 + $0x118] sm:$0xff]   ;;  %v892_v58 = vld [vmem:[%s1167_s3 + $0x160] sm:$0xff]   ;;  %s642_s25 = sshll.u32 %s930_s24, 4  ;;  %s643_s25 = int_to_ptr.vmem [resolvable:$true] %s642_s25 }
  0x28   :  { %v893_v59 = vld [vmem:[%s1167_s3 + $0x120] sm:$0xff]   ;;  %v894_v60 = vld [vmem:[%s1167_s3 + $0x168] sm:$0xff]   ;;  %v896_v62 = vld [vmem:[%s1167_s3 + $0x170] sm:$0xff]   ;;  %s904_s26 = scalar_lea.vmem %s643_s25, 256  ;;  %p909_p1 = scmp.lt.s32.totalorder %s643_s25, %s643_s25 }
  0x29   :  { %v27_v43 = vadd.s32 128, %v26_v41  ;;  %v895_v61 = vld [vmem:[%s1167_s3 + $0x128] sm:$0xff]   ;;  %v897_v63 = vld [vmem:[%s1167_s3 + $0x130] sm:$0xff]   ;;  %v898_v0 = vld [vmem:[%s1167_s3 + $0x178] sm:$0xff]   ;;  %p905_p0 = scmp.ne.s32.totalorder %s643_s25, %s904_s26  ;;  %p910_p2 = scmp.lt.s32.totalorder %s904_s26, %s904_s26 }
  0x2a   :  { %v899_v1 = vld [vmem:[%s1167_s3 + $0x138] sm:$0xff]  }
  0x2b   :  { %p911_p3 = por %p910_p2, %p909_p1 }
  0x2d   :  { %p912_p4 = pnand %p911_p3, %p905_p0 }
  0x81   :  { %v44_v42 = vpop.permute.xlu1 %43 }
  0x82   :  { %v32_v44 = vpop.permute.xlu0 %31  ;;  %vm48_vm0 = vcmp.eq.s32.totalorder %v26_v41, %v44_v42  ;;  %vm49_vm2 = vcmp.eq.s32.totalorder %v27_v43, %v44_v42 }
  0x83   :  { %vm36_vm1 = vcmp.eq.s32.totalorder %v26_v41, %v32_v44  ;;  %vm37_vm3 = vcmp.eq.s32.totalorder %v27_v43, %v32_v44 }
  0x84   :  { %vm52_vm6 = vmor %vm36_vm1, %vm48_vm0 }
  0x85   :  { %v47_v45 = vpop.permute.xlu1 %46  ;;  %vm53_vm9 = vmor %vm37_vm3, %vm49_vm2 }
  0x86   :  { %v35_v46 = vpop.permute.xlu0 %34  ;;  %vm50_vm4 = vcmp.eq.s32.totalorder %v26_v41, %v47_v45  ;;  %vm51_vm7 = vcmp.eq.s32.totalorder %v27_v43, %v47_v45  ;;  %v778_v45 = vld [vmem:[%s1169_s5] ss:$0 sm:$0xff] }
  0x87   :  { %vm38_vm5 = vcmp.eq.s32.totalorder %v26_v41, %v35_v46  ;;  %vm39_vm8 = vcmp.eq.s32.totalorder %v27_v43, %v35_v46 }
  0x88   :  { %vm54_vm10 = vmor %vm38_vm5, %vm50_vm4 }
  0x89   :  { %v63_v47 = vpop.permute.xlu1 %62  ;;  %vm55_vm11 = vmor %vm39_vm8, %vm51_vm7 }
  0x8a   :  { %v60_v48 = vpop.permute.xlu0 %59  ;;  %vm66_vm12 = vcmp.eq.s32.totalorder %v26_v41, %v63_v47  ;;  %vm67_vm15 = vcmp.eq.s32.totalorder %v27_v43, %v63_v47 }
  0x8b   :  { %vm64_vm13 = vcmp.eq.s32.totalorder %v26_v41, %v60_v48  ;;  %vm65_vm14 = vcmp.eq.s32.totalorder %v27_v43, %v60_v48  ;;  %vm70_vm0 = vmor %vm54_vm10, %vm66_vm12  ;;  %v777_v43 = vld [vmem:[%s1168_s4] ss:$0 sm:$0xff] }
  0x8c   :  { %vm68_vm1 = vmor %vm52_vm6, %vm64_vm13  ;;  %vm589_vm6 = vcmask 261120  }
  0x8d   :  { %vm69_vm2 = vmor %vm53_vm9, %vm65_vm14 }
  0x8e   :  { %vm71_vm3 = vmor %vm55_vm11, %vm67_vm15 }
  0x8f   :  { %vm701_vm4 = vmpackc.low %vm71_vm3, %vm69_vm2 }
  0x90   :  { %702 = vmatprep.mubr.msk.bf16.mxu0 %vm701_vm4, %v929_v51  ;;  %722 = vmatprep.mubr.msk.bf16.mxu1 %vm701_vm4, %v929_v51  ;;  %vm1091_vm5 = vmpackc.low %vm70_vm0, %vm68_vm1 }
  0x91   :  { %704 = vmatmul.mubr.msk.bf16.vlgmr.msra.gmra.mrb[0].mxu0 %vm1091_vm5, %v929_v51  ;;  %724 = vmatmul.mubr.msk.bf16.vlgmr.msra.gmra.mrb[0].mxu1 %vm1091_vm5, %v929_v51 }
  0x92   :  { %824 = vmatpush3.bf16.msra.mxu0 %v885_v49  ;;  %774 = vmatprep.mubr.msk.bf16.mxu0 %vm701_vm4, %v929_v51 }
  0x93   :  { %825 = vmatprep.subr.bf16.mxu0 %v886_v50 }
  0x96   :  { %826 = vmatpush3.bf16.msra.mxu0 %v887_v53 }
  0x97   :  { %827 = vmatprep.subr.bf16.mxu0 %v888_v54 }
  0x9a   :  { %828 = vmatpush3.bf16.msra.mxu0 %v889_v55 }
  0x9b   :  { %829 = vmatprep.subr.bf16.mxu0 %v890_v56 }
  0x9e   :  { %830 = vmatpush3.bf16.msra.mxu0 %v891_v57 }
  0x9f   :  { %831 = vmatprep.subr.bf16.mxu0 %v892_v58 }
  0xa2   :  { %832 = vmatpush3.bf16.msra.mxu0 %v893_v59 }
  0xa3   :  { %833 = vmatprep.subr.bf16.mxu0 %v894_v60 }
  0xa6   :  { %834 = vmatpush3.bf16.msra.mxu0 %v895_v61 }
  0xa7   :  { %835 = vmatprep.subr.bf16.mxu0 %v896_v62 }
  0xaa   :  { %836 = vmatpush3.bf16.msra.mxu0 %v897_v63 }
  0xab   :  { %837 = vmatprep.subr.bf16.mxu0 %v898_v0 }
  0xae   :  { %838 = vmatpush3.bf16.msra.mxu0 %v899_v1 }
  0xb1   :  { %776 = vmatmul.mubr.msk.bf16.vlgmr.msra.gmra.mrb[4].mxu0 %vm1091_vm5, %v929_v51 }
 0x164   :  { %v795_v2 = vpop.f32.mrb[0].mxu0  ;;  %v817_v3 = vpop.f32.mrb[0].mxu1 }
 0x165   :  { %v796_v4 = vpop.f32.mrb[1].mxu0  ;;  %v818_v5 = vpop.f32.mrb[1].mxu1 }
 0x166   :  { %v797_v6 = vadd.f32 %v796_v4, %v795_v2  ;;  %v819_v7 = vadd.f32 %v818_v5, %v817_v3  ;;  %v798_v8 = vpop.f32.mrb[2].mxu0  ;;  %v820_v9 = vpop.f32.mrb[2].mxu1 }
 0x167   :  { %v799_v10 = vpop.f32.mrb[3].mxu0  ;;  %v821_v11 = vpop.f32.mrb[3].mxu1 }
 0x168   :  { %v411_v12 = vadd.f32 %v819_v7, %v797_v6  ;;  %v800_v13 = vadd.f32 %v799_v10, %v798_v8  ;;  %v822_v14 = vadd.f32 %v821_v11, %v820_v9 }
 0x16a   :  { %v414_v15 = vadd.f32 %v822_v14, %v800_v13 }
 0x184   :  { %v839_v16 = vpop.f32.mrb[4].mxu0 }
 0x185   :  { %v840_v17 = vpop.f32.mrb[5].mxu0 }
 0x186   :  { %v841_v18 = vadd.f32 %v840_v17, %v839_v16  ;;  %v842_v19 = vpop.f32.mrb[6].mxu0 }
 0x187   :  { %v843_v20 = vpop.f32.mrb[7].mxu0 }
 0x188   :  { %v844_v21 = vadd.f32 %v843_v20, %v842_v19  ;;  %v587_v22 = vadd.f32 %v841_v18, %v411_v12 }
 0x18a   :  { %v590_v23 = vsel %vm589_vm6, %v587_v22, 0.0  ;;  %v588_v24 = vadd.f32 %v844_v21, %v414_v15 }
 0x18b   :  { %591 = vadd.xlane.f32.xlu0 %v590_v23 }
 0x18c   :  { %v593_v25 = vsel %vm589_vm6, %v588_v24, 0.0 }
 0x18d   :  { %594 = vadd.xlane.f32.xlu1 %v593_v25 }
 0x218   :  { %v592_v26 = vpop.xlane.xlu0 %591 }
 0x219   :  { %v597_v27 = vmul.f32 0.03125, %v592_v26 }
 0x21a   :  { %v595_v28 = vpop.xlane.xlu1 %594 }
 0x21b   :  { %v599_v29 = vsub.f32 %v587_v22, %v597_v27  ;;  %v598_v30 = vmul.f32 0.03125, %v595_v28 }
 0x21d   :  { %v600_v31 = vsub.f32 %v588_v24, %v598_v30  ;;  %v601_v32 = vmul.f32 %v599_v29, %v599_v29 }
 0x21f   :  { %v603_v33 = vsel %vm589_vm6, %v601_v32, 0.0  ;;  %v602_v34 = vmul.f32 %v600_v31, %v600_v31 }
 0x220   :  { %604 = vadd.xlane.f32.xlu0 %v603_v33 }
 0x221   :  { %v606_v35 = vsel %vm589_vm6, %v602_v34, 0.0 }
 0x224   :  { %607 = vadd.xlane.f32.xlu0 %v606_v35 }
 0x2ad   :  { %v605_v36 = vpop.xlane.xlu0 %604 }
 0x2ae   :  { %v609_v37 = vmul.f32 0.03125, %v605_v36 }
 0x2b0   :  { %v611_v38 = vadd.f32 1e-05, %v609_v37 }
 0x2b1   :  { %v608_v39 = vpop.xlane.xlu0 %607 }
 0x2b2   :  { %900 = vrsqrt.f32 %v611_v38  ;;  %v610_v40 = vmul.f32 0.03125, %v608_v39 }
 0x2b4   :  { %v612_v41 = vadd.f32 1e-05, %v610_v40 }
 0x2b6   :  { %902 = vrsqrt.f32 %v612_v41 }
 0x2bc   :  { %v901_v42 = vpop.eup %900 }
 0x2bd   :  { %v615_v44 = vmul.f32 %v901_v42, %v599_v29 }
 0x2bf   :  { %v624_v46 = vmul.f32 %v777_v43, %v615_v44 }
 0x2c0   :  { %v903_v47 = vpop.eup %902 }
 0x2c1   :  { %v616_v48 = vmul.f32 %v903_v47, %v600_v31  ;;  %v633_v49 = vadd.f32 %v778_v45, %v624_v46 }
 0x2c3   :  { %v625_v50 = vmul.f32 %v777_v43, %v616_v48  ;;  %635 = vst.msk [vmem:[#allocation2] sm:$0xff] %vm589_vm6, %v633_v49 }
 0x2c5   :  { %v634_v51 = vadd.f32 %v778_v45, %v625_v50 }
 0x2c7   :  { %636 = vst.msk [vmem:[#allocation2 + $0x8] sm:$0xff] %vm589_vm6, %v634_v51 }
 0x2c8   :  { %915 = shalt.err (!%p912_p4)
}
 0x2c9   :  { %s916_s27 = scalar_lea.hbm %s1170_s6, 256 }
 0x2ca   :  { %p917_p5 = scmp.ne.s32.totalorder %s1170_s6, %s916_s27  ;;  %p920_p6 = scmp.lt.u32.totalorder %s916_s27, %s1170_s6 }
 0x2cc   :  { %p922_p7 = pnand %p920_p6, %p917_p5 }
 0x2ce   :  { %925 = shalt.err (!%p922_p7)
}
 0x2cf   :  { %s931_s8 = smov 128   ;;  %s932_s9 = smov 8  }
 0x2d0   :  { %648 = dma.vmem_to_hbm [thread:$0]  %s643_s25, 256, %s1170_s6, [#allocation3], %s931_s8, %s931_s8, %s932_s9  }
 0x2d1   :  { %926 = dma.done.wait [#allocation3], 256  }
 0x2d2   :  { %927 = vsyncadd [#allocation3], 4294967040 }
 0x2d3   :  { %652 = vsyncpa [#allocation3], 1 }

</bundles_post_ra>
